<compile_context>
chip_gen: v7x
topology: tpu7x:2x2x1
jax: 0.10.0
libtpu: 0.0.40
codegen_flags: <defaults>
</compile_context>

<pallas_src>
import functools

import jax
import jax.numpy as jnp
from jax.experimental import pallas as pl
from jax.experimental.pallas import tpu as pltpu

F_IN = 5        # fc1 in_features
HID = 100       # fc1/fc2 out_features
F_IN_PAD = 8    # sublane-aligned input features
HID_PAD = 128   # lane-aligned hidden width


def mlp_kernel(x_ref, w1_ref, b1_ref, w2_ref, b2_ref, w3_ref, b3_ref, o_ref,
               *, n_in):
    # x_ref : (F_IN_PAD, TB)   block of x^T  (features x batch-tile), f32
    # w1_ref: (HID_PAD, F_IN_PAD) f32, b1_ref: (HID_PAD, 1) f32
    # w2_ref: (HID_PAD, HID_PAD) bf16, b2_ref: (HID_PAD, 1) f32
    # w3_ref: (HID_PAD, 1) f32,        b3_ref: (1, 1) scalar in SMEM
    # o_ref : (1, TB)          lane-dense output row

    # ---- Layer 1 (K=5): rank-1 VPU updates; bias added via implicit
    #      broadcast on the first term (no materialized broadcast temp).
    h1 = w1_ref[:, 0:1] * x_ref[0:1, :] + b1_ref[...]
    for k in range(1, n_in):                                # static, unrolled
        h1 = h1 + w1_ref[:, k:k + 1] * x_ref[k:k + 1, :]
    h1 = jnp.maximum(h1, 0.0)

    # ---- Layer 2: the one real 128x128 MXU matmul. bf16 inputs (native
    #      single-pass MXU on all generations), f32 accumulation.
    h2 = jnp.dot(w2_ref[...], h1.astype(jnp.bfloat16),
                 preferred_element_type=jnp.float32)
    h2 = jnp.maximum(h2 + b2_ref[...], 0.0)

    # ---- Layer 3 (N=1): elementwise multiply + cross-sublane reduce (XLU),
    #      result is already lane-dense along the batch tile.
    y = jnp.sum(h2 * w3_ref[...], axis=0, keepdims=True) + b3_ref[0, 0]

    o_ref[...] = y.astype(o_ref.dtype)


def _batch_tiling(batch):
    """Pick (TB, n_tiles): tiles as wide as possible (<=2048 lanes) to
    amortize per-grid-step overhead, but always >= 2 tiles so both v7x
    TensorCores get work (no effect on single-TC v5e/v6e)."""
    blocks = max(2, -(-batch // 128))           # 128-lane blocks, >= 2
    tb_blocks = max(1, min(16, blocks // 2))    # tile width in blocks
    n_tiles = -(-blocks // tb_blocks)
    return 128 * tb_blocks, n_tiles


def prepare_params(params):
    """One-time padding/casting of the PyTorch-layout params ((out, in)
    weights) into TPU-tile-friendly, VMEM-resident operands."""
    w1, b1, w2, b2, w3, b3 = params
    f32 = jnp.float32
    w1_p = jnp.zeros((HID_PAD, F_IN_PAD), f32).at[:HID, :F_IN].set(
        w1.astype(f32))
    b1_p = jnp.zeros((HID_PAD, 1), f32).at[:HID, 0].set(b1.astype(f32))
    w2_p = jnp.zeros((HID_PAD, HID_PAD), jnp.bfloat16).at[:HID, :HID].set(
        w2.astype(jnp.bfloat16))
    b2_p = jnp.zeros((HID_PAD, 1), f32).at[:HID, 0].set(b2.astype(f32))
    w3_p = jnp.zeros((HID_PAD, 1), f32).at[:HID, 0].set(w3[0].astype(f32))
    b3_p = b3.reshape(1, 1).astype(f32)
    return (w1_p, b1_p, w2_p, b2_p, w3_p, b3_p)


@jax.jit
def net_forward(x, padded_params):
    w1_p, b1_p, w2_p, b2_p, w3_p, b3_p = padded_params
    B = x.shape[0]

    TB, n_tiles = _batch_tiling(B)
    B_pad = n_tiles * TB

    # Transpose + zero-pad x so the operand is (8,128)-tile friendly; padded
    # columns are zeros and get sliced off below.
    x_t = jnp.zeros((F_IN_PAD, B_pad), jnp.float32).at[:F_IN, :B].set(
        x.T.astype(jnp.float32))

    out = pl.pallas_call(
        functools.partial(mlp_kernel, n_in=F_IN),
        out_shape=jax.ShapeDtypeStruct((1, B_pad), jnp.float32),
        grid=(n_tiles,),
        in_specs=[
            pl.BlockSpec((F_IN_PAD, TB), lambda i: (0, i)),       # x^T tile (pipelined)
            pl.BlockSpec((HID_PAD, F_IN_PAD), lambda i: (0, 0)),  # W1, resident
            pl.BlockSpec((HID_PAD, 1), lambda i: (0, 0)),         # b1
            pl.BlockSpec((HID_PAD, HID_PAD), lambda i: (0, 0)),   # W2 (bf16), resident
            pl.BlockSpec((HID_PAD, 1), lambda i: (0, 0)),         # b2
            pl.BlockSpec((HID_PAD, 1), lambda i: (0, 0)),         # w3 column
            pl.BlockSpec(memory_space=pltpu.SMEM),                # b3 scalar
        ],
        out_specs=pl.BlockSpec((1, TB), lambda i: (0, i)),        # lane-dense row
        compiler_params=pltpu.CompilerParams(
            dimension_semantics=("parallel",),
        ),
    )(x_t, w1_p, b1_p, w2_p, b2_p, w3_p, b3_p)

    # lane-dense (1, B_pad) -> (B, 1), dropping batch padding.
    return out[0, :B].reshape(B, 1).astype(x.dtype)


def init_params(key):
    # Deterministic init mirroring nn.Linear (weights stored (out, in)).
    k1, k2, k3, k4, k5, k6 = jax.random.split(key, 6)

    def uniform(k, shape, fan_in):
        bound = 1.0 / jnp.sqrt(fan_in)
        return jax.random.uniform(k, shape, jnp.float32, -bound, bound)

    w1 = uniform(k1, (HID, F_IN), F_IN)   # fc1.weight
    b1 = uniform(k2, (HID,), F_IN)        # fc1.bias
    w2 = uniform(k3, (HID, HID), HID)     # fc2.weight
    b2 = uniform(k4, (HID,), HID)         # fc2.bias
    w3 = uniform(k5, (1, HID), HID)       # fc3.weight
    b3 = uniform(k6, (1,), HID)           # fc3.bias
    return (w1, b1, w2, b2, w3, b3)


if __name__ == "__main__":
    key = jax.random.PRNGKey(0)
    pkey, xkey = jax.random.split(key)
    params = init_params(pkey)
    padded_params = jax.block_until_ready(prepare_params(params))  # one-time

    B = 8
    x = jax.random.normal(xkey, (B, F_IN), jnp.float32)

    out = net_forward(x, padded_params)
    jax.block_until_ready(out)

    # Reference check in plain JAX (PyTorch semantics: y = x @ W.T + b).
    # Tolerance relaxed vs f32 because layer 2 feeds the MXU in bf16.
    w1, b1, w2, b2, w3, b3 = params
    ref = jnp.maximum(x @ w1.T + b1, 0.0)
    ref = jnp.maximum(ref @ w2.T + b2, 0.0)
    ref = ref @ w3.T + b3

    assert out.shape == (B, 1)
    max_diff = float(jnp.max(jnp.abs(out - ref)))
    assert jnp.allclose(out, ref, atol=5e-2, rtol=5e-2), max_diff

    print("KERNEL_OK")
</pallas_src>

<mosaic_0001>
module attributes {stable_mosaic.version = 11 : i64} {
  func.func @mlp_kernel(%arg0: i32, %arg1: memref<8x128xf32, #tpu.memory_space<vmem>>, %arg2: memref<128x8xf32, #tpu.memory_space<vmem>>, %arg3: memref<128x1xf32, #tpu.memory_space<vmem>>, %arg4: memref<128x128xbf16, #tpu.memory_space<vmem>>, %arg5: memref<128x1xf32, #tpu.memory_space<vmem>>, %arg6: memref<128x1xf32, #tpu.memory_space<vmem>>, %arg7: memref<1x1xf32, #tpu.memory_space<smem>>, %arg8: memref<1x128xf32, #tpu.memory_space<vmem>>) attributes {dimension_semantics = [#tpu.dimension_semantics<parallel>], iteration_bounds = array<i64: 2>, scalar_prefetch = 0 : i64, scratch_operands = 0 : i64, tpu.core_type = #tpu.core_type<tc>, window_params = [{transform_indices = @transform_0, window_bounds = array<i64: 8, 128>}, {pipeline_mode = #tpu.pipeline_mode<synchronous>, transform_indices = @transform_1, window_bounds = array<i64: 128, 8>}, {pipeline_mode = #tpu.pipeline_mode<synchronous>, transform_indices = @transform_2, window_bounds = array<i64: 128, 1>}, {pipeline_mode = #tpu.pipeline_mode<synchronous>, transform_indices = @transform_3, window_bounds = array<i64: 128, 128>}, {pipeline_mode = #tpu.pipeline_mode<synchronous>, transform_indices = @transform_4, window_bounds = array<i64: 128, 1>}, {pipeline_mode = #tpu.pipeline_mode<synchronous>, transform_indices = @transform_5, window_bounds = array<i64: 128, 1>}, {transform_indices = @transform_6, window_bounds = array<i64: 1, 1>}, {transform_indices = @transform_7, window_bounds = array<i64: 1, 128>}]} {
    %c0 = arith.constant 0 : index
    %c0_0 = arith.constant 0 : index
    %0 = vector.load %arg2[%c0, %c0_0] : memref<128x8xf32, #tpu.memory_space<vmem>>, vector<128x1xf32>
    %c0_1 = arith.constant 0 : index
    %c0_2 = arith.constant 0 : index
    %1 = vector.load %arg1[%c0_1, %c0_2] : memref<8x128xf32, #tpu.memory_space<vmem>>, vector<1x128xf32>
    %2 = vector.broadcast %0 : vector<128x1xf32> to vector<128x128xf32>
    %3 = vector.broadcast %1 : vector<1x128xf32> to vector<128x128xf32>
    %4 = arith.mulf %2, %3 : vector<128x128xf32>
    %c0_3 = arith.constant 0 : index
    %c0_4 = arith.constant 0 : index
    %5 = vector.load %arg3[%c0_3, %c0_4] : memref<128x1xf32, #tpu.memory_space<vmem>>, vector<128x1xf32>
    %6 = vector.broadcast %5 : vector<128x1xf32> to vector<128x128xf32>
    %7 = arith.addf %4, %6 : vector<128x128xf32>
    %c0_5 = arith.constant 0 : index
    %c1 = arith.constant 1 : index
    %8 = vector.load %arg2[%c0_5, %c1] : memref<128x8xf32, #tpu.memory_space<vmem>>, vector<128x1xf32>
    %c1_6 = arith.constant 1 : index
    %c0_7 = arith.constant 0 : index
    %9 = vector.load %arg1[%c1_6, %c0_7] : memref<8x128xf32, #tpu.memory_space<vmem>>, vector<1x128xf32>
    %10 = vector.broadcast %8 : vector<128x1xf32> to vector<128x128xf32>
    %11 = vector.broadcast %9 : vector<1x128xf32> to vector<128x128xf32>
    %12 = arith.mulf %10, %11 : vector<128x128xf32>
    %13 = arith.addf %7, %12 : vector<128x128xf32>
    %c0_8 = arith.constant 0 : index
    %c2 = arith.constant 2 : index
    %14 = vector.load %arg2[%c0_8, %c2] : memref<128x8xf32, #tpu.memory_space<vmem>>, vector<128x1xf32>
    %c2_9 = arith.constant 2 : index
    %c0_10 = arith.constant 0 : index
    %15 = vector.load %arg1[%c2_9, %c0_10] : memref<8x128xf32, #tpu.memory_space<vmem>>, vector<1x128xf32>
    %16 = vector.broadcast %14 : vector<128x1xf32> to vector<128x128xf32>
    %17 = vector.broadcast %15 : vector<1x128xf32> to vector<128x128xf32>
    %18 = arith.mulf %16, %17 : vector<128x128xf32>
    %19 = arith.addf %13, %18 : vector<128x128xf32>
    %c0_11 = arith.constant 0 : index
    %c3 = arith.constant 3 : index
    %20 = vector.load %arg2[%c0_11, %c3] : memref<128x8xf32, #tpu.memory_space<vmem>>, vector<128x1xf32>
    %c3_12 = arith.constant 3 : index
    %c0_13 = arith.constant 0 : index
    %21 = vector.load %arg1[%c3_12, %c0_13] : memref<8x128xf32, #tpu.memory_space<vmem>>, vector<1x128xf32>
    %22 = vector.broadcast %20 : vector<128x1xf32> to vector<128x128xf32>
    %23 = vector.broadcast %21 : vector<1x128xf32> to vector<128x128xf32>
    %24 = arith.mulf %22, %23 : vector<128x128xf32>
    %25 = arith.addf %19, %24 : vector<128x128xf32>
    %c0_14 = arith.constant 0 : index
    %c4 = arith.constant 4 : index
    %26 = vector.load %arg2[%c0_14, %c4] : memref<128x8xf32, #tpu.memory_space<vmem>>, vector<128x1xf32>
    %c4_15 = arith.constant 4 : index
    %c0_16 = arith.constant 0 : index
    %27 = vector.load %arg1[%c4_15, %c0_16] : memref<8x128xf32, #tpu.memory_space<vmem>>, vector<1x128xf32>
    %28 = vector.broadcast %26 : vector<128x1xf32> to vector<128x128xf32>
    %29 = vector.broadcast %27 : vector<1x128xf32> to vector<128x128xf32>
    %30 = arith.mulf %28, %29 : vector<128x128xf32>
    %31 = arith.addf %25, %30 : vector<128x128xf32>
    %cst = arith.constant 0.000000e+00 : f32
    %32 = vector.broadcast %cst : f32 to vector<128x128xf32>
    %33 = arith.maximumf %31, %32 : vector<128x128xf32>
    %c0_17 = arith.constant 0 : index
    %c0_18 = arith.constant 0 : index
    %34 = vector.load %arg4[%c0_17, %c0_18] : memref<128x128xbf16, #tpu.memory_space<vmem>>, vector<128x128xbf16>
    %35 = arith.truncf %33 : vector<128x128xf32> to vector<128x128xbf16>
    %cst_19 = arith.constant dense<0.000000e+00> : vector<128x128xf32>
    %36 = tpu.matmul %34, %35, %cst_19 {dimension_numbers = #tpu.dot_dimension_numbers<[1], [0], [0], [1], [0, 0, 1, 1], [], []>} : vector<128x128xbf16>, vector<128x128xbf16>, vector<128x128xf32> -> vector<128x128xf32>
    %c0_20 = arith.constant 0 : index
    %c0_21 = arith.constant 0 : index
    %37 = vector.load %arg5[%c0_20, %c0_21] : memref<128x1xf32, #tpu.memory_space<vmem>>, vector<128x1xf32>
    %38 = vector.broadcast %37 : vector<128x1xf32> to vector<128x128xf32>
    %39 = arith.addf %36, %38 : vector<128x128xf32>
    %cst_22 = arith.constant 0.000000e+00 : f32
    %40 = vector.broadcast %cst_22 : f32 to vector<128x128xf32>
    %41 = arith.maximumf %39, %40 : vector<128x128xf32>
    %c0_23 = arith.constant 0 : index
    %c0_24 = arith.constant 0 : index
    %42 = vector.load %arg6[%c0_23, %c0_24] : memref<128x1xf32, #tpu.memory_space<vmem>>, vector<128x1xf32>
    %43 = vector.broadcast %42 : vector<128x1xf32> to vector<128x128xf32>
    %44 = arith.mulf %41, %43 : vector<128x128xf32>
    %cst_25 = arith.constant dense<0.000000e+00> : vector<128xf32>
    %45 = vector.multi_reduction <add>, %44, %cst_25 [0] : vector<128x128xf32> to vector<128xf32>
    %46 = vector.shape_cast %45 : vector<128xf32> to vector<1x128xf32>
    %c0_26 = arith.constant 0 : index
    %c0_27 = arith.constant 0 : index
    %47 = memref.load %arg7[%c0_26, %c0_27] : memref<1x1xf32, #tpu.memory_space<smem>>
    %48 = vector.broadcast %47 : f32 to vector<1x128xf32>
    %49 = arith.addf %46, %48 : vector<1x128xf32>
    %c0_28 = arith.constant 0 : index
    %c0_29 = arith.constant 0 : index
    %50 = vector.load %arg8[%c0_28, %c0_29] : memref<1x128xf32, #tpu.memory_space<vmem>>, vector<1x128xf32>
    tpu.vector_store %arg8[%c0_28, %c0_29], %49 {strides = array<i32>} : memref<1x128xf32, #tpu.memory_space<vmem>>, vector<1x128xf32>,
    return
  }
  func.func @transform_0(%arg0: i32) -> (i32, i32) {
    %c0_i32 = arith.constant 0 : i32
    %c0_i32_0 = arith.constant 0 : i32
    return %c0_i32, %arg0 : i32, i32
  }
  func.func @transform_1(%arg0: i32) -> (i32, i32) {
    %c0_i32 = arith.constant 0 : i32
    %c0_i32_0 = arith.constant 0 : i32
    %c0_i32_1 = arith.constant 0 : i32
    return %c0_i32, %c0_i32_0 : i32, i32
  }
  func.func @transform_2(%arg0: i32) -> (i32, i32) {
    %c0_i32 = arith.constant 0 : i32
    %c0_i32_0 = arith.constant 0 : i32
    %c0_i32_1 = arith.constant 0 : i32
    return %c0_i32, %c0_i32_0 : i32, i32
  }
  func.func @transform_3(%arg0: i32) -> (i32, i32) {
    %c0_i32 = arith.constant 0 : i32
    %c0_i32_0 = arith.constant 0 : i32
    %c0_i32_1 = arith.constant 0 : i32
    return %c0_i32, %c0_i32_0 : i32, i32
  }
  func.func @transform_4(%arg0: i32) -> (i32, i32) {
    %c0_i32 = arith.constant 0 : i32
    %c0_i32_0 = arith.constant 0 : i32
    %c0_i32_1 = arith.constant 0 : i32
    return %c0_i32, %c0_i32_0 : i32, i32
  }
  func.func @transform_5(%arg0: i32) -> (i32, i32) {
    %c0_i32 = arith.constant 0 : i32
    %c0_i32_0 = arith.constant 0 : i32
    %c0_i32_1 = arith.constant 0 : i32
    return %c0_i32, %c0_i32_0 : i32, i32
  }
  func.func @transform_6(%arg0: i32) -> (i32, i32) {
    %c0_i32 = arith.constant 0 : i32
    %c0_i32_0 = arith.constant 0 : i32
    %c0_i32_1 = arith.constant 0 : i32
    return %c0_i32, %c0_i32_0 : i32, i32
  }
  func.func @transform_7(%arg0: i32) -> (i32, i32) {
    %c0_i32 = arith.constant 0 : i32
    %c0_i32_0 = arith.constant 0 : i32
    return %c0_i32, %arg0 : i32, i32
  }
}

</mosaic_0001>

<bundles_post_ra>
// kernel: net_forward.1
= control target key start
LH: loop header
LB: loop body
LE: loop exit
PB: predicated region body
PF: predicated region fallthrough
CT: control target
= control target key end

     0   :  { %s1592_s26 = smov 0   ;;  %s2210_s0 = inlined_call_operand.vmem [shape: f32[8,256], index: 0, kind: input, shape index: {}]   ;;  %s2211_s1 = inlined_call_operand.vmem [shape: f32[128,8], index: 1, kind: input, shape index: {}]   ;;  %s2212_s2 = inlined_call_operand.vmem [shape: f32[128,1], index: 2, kind: input, shape index: {}]   ;;  %s2213_s3 = inlined_call_operand.vmem [shape: bf16[128,128], index: 3, kind: input, shape index: {}]   ;;  %s2214_s4 = inlined_call_operand.vmem [shape: f32[128,1], index: 4, kind: input, shape index: {}]   ;;  %s2215_s5 = inlined_call_operand.vmem [shape: f32[128,1], index: 5, kind: input, shape index: {}]   ;;  %s2216_s6 = inlined_call_operand.<no memory space> [shape: f32[1,1], index: 6, kind: input, shape index: {}]   ;;  %s2217_s7 = inlined_call_operand.vmem [shape: f32[1,256], index: 7, kind: output, shape index: {}]  }
   0x1   :  { %12 = sst [smem:[#allocation2]] %s2216_s6 }
   0x2 LB: > { %s1388_s27 = sadd.s32 4294967295, %s1542_s26   ;;  %p1392_p0 = scmp.ge.s32.totalorder %s1542_s26, 1  ;;  %s1542_s26 = sphi %s1592_s26, %s18_s26  }
   0x3   : > { %p237_p1 = scmp.lt.s32.totalorder %s1542_s26, 3 }
   0x5   : > { %p238_p2 = pnand %p1392_p0, %p237_p1 }
   0x7   : > { %241 = sbr.rel (%p238_p2) target bundleno = 682 (0x2aa), region = 48 }
   0xe   : > { %v1603_v0 = vld [vmem:[%s2211_s1 + $0x10] sm:$0xff]  ;;  %v1608_v1 = vld [vmem:[%s2211_s1] sm:$0xff]  ;;  %v2218_v2 = vmov 0   ;;  %v1617_v3 = vld [vmem:[%s2211_s1 + $0x18] sm:$0xff]  ;;  %v1545_v33 = vmov 1   ;;  %v2219_v34 = vmov 3  }
   0xf   : > { %1487 = vset.pattern.permute.xlu1 %v2218_v2  ;;  %1486 = vset.pattern.permute.xlu0 %v2218_v2  ;;  %v1622_v4 = vld [vmem:[%s2211_s1 + $0x8] sm:$0xff]  ;;  %v1634_v6 = vld [vmem:[%s2211_s1 + $0x20] sm:$0xff]  ;;  %v1641_v7 = vld [vmem:[%s2211_s1 + $0x38] sm:$0xff]  ;;  %v2222_v35 = vmov 2   ;;  %v2220_v36 = vmov 4   ;;  %p266_p3 = scmp.lt.s32.totalorder %s1388_s27, 1 }
  0x10   : > { %303 = vperm.xlu1 %1487, %v1603_v0   ;;  %293 = vperm.xlu0 %1486, %v1608_v1   ;;  %v1629_v5 = vld [vmem:[%s2211_s1 + $0x28] sm:$0xff]  ;;  %v1646_v8 = vld [vmem:[%s2211_s1 + $0x30] sm:$0xff]  ;;  %v1656_v10 = vld [vmem:[%s2211_s1 + $0x40] sm:$0xff]  ;;  %s1337_s20 = sld [smem:[#allocation2]] }
  0x11   : > { %v1651_v9 = vld [vmem:[%s2211_s1 + $0x48] sm:$0xff]  ;;  %v1665_v11 = vld [vmem:[%s2211_s1 + $0x58] sm:$0xff]  ;;  %v1670_v12 = vld [vmem:[%s2211_s1 + $0x50] sm:$0xff]  ;;  %s2230_s27 = smov (!%p266_p3, %s1388_s27), 1 }
  0x12   : > { %v1677_v13 = vld [vmem:[%s2211_s1 + $0x68] sm:$0xff]  ;;  %v1682_v14 = vld [vmem:[%s2211_s1 + $0x60] sm:$0xff]  ;;  %v1689_v15 = vld [vmem:[%s2211_s1 + $0x78] sm:$0xff]  ;;  %s1393_s24 = sshll.u32 %s2230_s27, 3  ;;  %s272_s23 = scalar_lea.vmem %s2217_s7, %s2230_s27 }
  0x13   : > { %v1694_v16 = vld [vmem:[%s2211_s1 + $0x70] sm:$0xff]  ;;  %v392_v17 = vld [vmem:[%s2212_s2 + $0x8] sm:$0xff]  ;;  %v391_v18 = vld [vmem:[%s2212_s2] sm:$0xff]  ;;  %s1823_s29 = scalar_lea.vmem %s2210_s0, %s1393_s24 }
  0x14   : > { %308 = vperm.xlu1 %1487, %v1617_v3   ;;  %298 = vperm.xlu0 %1486, %v1622_v4   ;;  %v394_v19 = vld [vmem:[%s2212_s2 + $0x18] sm:$0xff]  ;;  %v393_v20 = vld [vmem:[%s2212_s2 + $0x10] sm:$0xff]  ;;  %v396_v21 = vld [vmem:[%s2212_s2 + $0x28] sm:$0xff] }
  0x15   : > { %v395_v22 = vld [vmem:[%s2212_s2 + $0x20] sm:$0xff]  ;;  %v398_v23 = vld [vmem:[%s2212_s2 + $0x38] sm:$0xff]  ;;  %v397_v24 = vld [vmem:[%s2212_s2 + $0x30] sm:$0xff] }
  0x16   : > { %v400_v25 = vld [vmem:[%s2212_s2 + $0x48] sm:$0xff]  ;;  %v399_v26 = vld [vmem:[%s2212_s2 + $0x40] sm:$0xff]  ;;  %v402_v27 = vld [vmem:[%s2212_s2 + $0x58] sm:$0xff] }
  0x17   : > { %v401_v28 = vld [vmem:[%s2212_s2 + $0x50] sm:$0xff]  ;;  %v404_v29 = vld [vmem:[%s2212_s2 + $0x68] sm:$0xff]  ;;  %v403_v30 = vld [vmem:[%s2212_s2 + $0x60] sm:$0xff] }
  0x18   : > { %318 = vperm.xlu1 %1487, %v1629_v5   ;;  %313 = vperm.xlu0 %1486, %v1634_v6   ;;  %v406_v31 = vld [vmem:[%s2212_s2 + $0x78] sm:$0xff]  ;;  %v405_v32 = vld [vmem:[%s2212_s2 + $0x70] sm:$0xff]  ;;  %v1829_v45 = vld [vmem:[%s1823_s29] ss:$0 sm:$0xff] }
  0x1c   : > { %328 = vperm.xlu1 %1487, %v1641_v7   ;;  %323 = vperm.xlu0 %1486, %v1646_v8  }
  0x20   : > { %338 = vperm.xlu1 %1487, %v1651_v9   ;;  %333 = vperm.xlu0 %1486, %v1656_v10  }
  0x24   : > { %348 = vperm.xlu1 %1487, %v1665_v11   ;;  %343 = vperm.xlu0 %1486, %v1670_v12  }
  0x28   : > { %358 = vperm.xlu1 %1487, %v1677_v13   ;;  %353 = vperm.xlu0 %1486, %v1682_v14  }
  0x2c   : > { %368 = vperm.xlu1 %1487, %v1689_v15   ;;  %363 = vperm.xlu0 %1486, %v1694_v16  }
  0x30   : > { %414 = vperm.xlu1 %1487, %v392_v17   ;;  %409 = vperm.xlu0 %1486, %v391_v18  }
  0x34   : > { %424 = vperm.xlu1 %1487, %v394_v19   ;;  %419 = vperm.xlu0 %1486, %v393_v20  }
  0x38   : > { %434 = vperm.xlu1 %1487, %v396_v21   ;;  %429 = vperm.xlu0 %1486, %v395_v22  }
  0x3c   : > { %444 = vperm.xlu1 %1487, %v398_v23   ;;  %439 = vperm.xlu0 %1486, %v397_v24  }
  0x40   : > { %454 = vperm.xlu1 %1487, %v400_v25   ;;  %449 = vperm.xlu0 %1486, %v399_v26  }
  0x44   : > { %464 = vperm.xlu1 %1487, %v402_v27   ;;  %459 = vperm.xlu0 %1486, %v401_v28  }
  0x48   : > { %474 = vperm.xlu1 %1487, %v404_v29   ;;  %469 = vperm.xlu0 %1486, %v403_v30  }
  0x4c   : > { %484 = vperm.xlu1 %1487, %v406_v31   ;;  %479 = vperm.xlu0 %1486, %v405_v32   ;;  %v1909_v32 = vld [vmem:[%s1823_s29 + $0x1] ss:$0 sm:$0xff] }
  0x50   : > { %1488 = vset.pattern.permute.xlu1 %v1545_v33  ;;  %1491 = vset.pattern.permute.xlu0 %v2219_v34 }
  0x51   : > { %509 = vperm.xlu1 %1488, %v1622_v4   ;;  %707 = vperm.xlu0 %1491, %v1608_v1  }
  0x55   : > { %513 = vperm.xlu1 %1488, %v1603_v0   ;;  %719 = vperm.xlu0 %1491, %v1617_v3  }
  0x59   : > { %1489 = vset.pattern.permute.xlu1 %v2222_v35  ;;  %1497 = vset.pattern.permute.xlu0 %v1545_v33 }
  0x5a   : > { %610 = vperm.xlu1 %1489, %v1622_v4   ;;  %505 = vperm.xlu0 %1497, %v1608_v1  }
  0x5e   : > { %1490 = vset.pattern.permute.xlu1 %v1545_v33  ;;  %521 = vperm.xlu0 %1497, %v1634_v6  }
  0x5f   : > { %517 = vperm.xlu1 %1490, %v1617_v3  }
  0x62   : > { %533 = vperm.xlu0 %1497, %v1641_v7  }
  0x63   : > { %1492 = vset.pattern.permute.xlu1 %v2219_v34 }
  0x64   : > { %711 = vperm.xlu1 %1492, %v1622_v4  }
  0x66   : > { %545 = vperm.xlu0 %1497, %v1670_v12  }
  0x68   : > { %1493 = vset.pattern.permute.xlu1 %v2222_v35 }
  0x69   : > { %614 = vperm.xlu1 %1493, %v1603_v0  }
  0x6a   : > { %557 = vperm.xlu0 %1497, %v1677_v13  }
  0x6d   : > { %1494 = vset.pattern.permute.xlu1 %v2220_v36 }
  0x6e   : > { %808 = vperm.xlu1 %1494, %v1608_v1   ;;  %1513 = vset.pattern.permute.xlu0 %v2220_v36 }
  0x6f   : > { %816 = vperm.xlu0 %1513, %v1603_v0  }
  0x72   : > { %812 = vperm.xlu1 %1494, %v1622_v4  }
  0x73   : > { %828 = vperm.xlu0 %1513, %v1629_v5  }
  0x76   : > { %1495 = vset.pattern.permute.xlu1 %v1545_v33 }
  0x77   : > { %525 = vperm.xlu1 %1495, %v1629_v5   ;;  %840 = vperm.xlu0 %1513, %v1656_v10  }
  0x7b   : > { %1496 = vset.pattern.permute.xlu1 %v2219_v34  ;;  %852 = vperm.xlu0 %1513, %v1665_v11  }
  0x7c   : > { %715 = vperm.xlu1 %1496, %v1603_v0  }
  0x7f   : > { %1517 = vset.pattern.permute.xlu0 %v2222_v35 }
  0x80   : > { %1498 = vset.pattern.permute.xlu1 %v2222_v35  ;;  %606 = vperm.xlu0 %1517, %v1608_v1  }
  0x81   : > { %622 = vperm.xlu1 %1498, %v1634_v6  }
  0x84   : > { %618 = vperm.xlu0 %1517, %v1617_v3  }
  0x85   : > { %626 = vperm.xlu1 %1498, %v1629_v5  }
  0x88   : > { %630 = vperm.xlu0 %1517, %v1646_v8  }
  0x89   : > { %1499 = vset.pattern.permute.xlu1 %v2220_v36 }
  0x8a   : > { %820 = vperm.xlu1 %1499, %v1617_v3  }
  0x8c   : > { %642 = vperm.xlu0 %1517, %v1651_v9  }
  0x8e   : > { %1500 = vset.pattern.permute.xlu1 %v1545_v33 }
  0x8f   : > { %v1789_v37 = vpop.permute.xlu1 %303  ;;  %529 = vperm.xlu1 %1500, %v1646_v8   ;;  %v1792_v38 = vpop.permute.xlu0 %293 }
  0x90   : > { %654 = vperm.xlu0 %1517, %v1682_v14  }
  0x93   : > { %v1797_v39 = vpop.permute.xlu1 %308  ;;  %1501 = vset.pattern.permute.xlu1 %v2219_v34  ;;  %v1800_v40 = vpop.permute.xlu0 %298 }
  0x94   : > { %723 = vperm.xlu1 %1501, %v1634_v6   ;;  %666 = vperm.xlu0 %1517, %v1689_v15  }
  0x97   : > { %v1808_v41 = vpop.permute.xlu1 %318  ;;  %v1810_v42 = vpop.permute.xlu0 %313 }
  0x98   : > { %727 = vperm.xlu1 %1501, %v1629_v5   ;;  %1521 = vset.pattern.permute.xlu0 %v2219_v34 }
  0x99   : > { %731 = vperm.xlu0 %1521, %v1646_v8  }
  0x9b   : > { %v1816_v43 = vpop.permute.xlu1 %328  ;;  %v1818_v44 = vpop.permute.xlu0 %323 }
  0x9c   : > { %1502 = vset.pattern.permute.xlu1 %v2222_v35 }
  0x9d   : > { %634 = vperm.xlu1 %1502, %v1641_v7   ;;  %743 = vperm.xlu0 %1521, %v1651_v9  }
  0x9f   : > { %v1831_v46 = vpop.permute.xlu1 %338  ;;  %v334_v47 = vpop.permute.xlu0 %333 }
  0xa0   : > { %v383_v48 = vmul.f32 %v1829_v45, %v334_v47 }
  0xa1   : > { %1503 = vset.pattern.permute.xlu1 %v2220_v36  ;;  %755 = vperm.xlu0 %1521, %v1682_v14  }
  0xa2   : > { %824 = vperm.xlu1 %1503, %v1634_v6  }
  0xa3   : > { %v1837_v49 = vpop.permute.xlu1 %348  ;;  %v344_v50 = vpop.permute.xlu0 %343 }
  0xa4   : > { %v385_v51 = vmul.f32 %v1829_v45, %v344_v50 }
  0xa5   : > { %763 = vperm.xlu0 %1521, %v1694_v16  }
  0xa6   : > { %1504 = vset.pattern.permute.xlu1 %v1545_v33 }
  0xa7   : > { %v1842_v52 = vpop.permute.xlu1 %358  ;;  %537 = vperm.xlu1 %1504, %v1656_v10   ;;  %v354_v53 = vpop.permute.xlu0 %353 }
  0xa8   : > { %v387_v54 = vmul.f32 %v1829_v45, %v354_v53 }
  0xa9   : > { %1525 = vset.pattern.permute.xlu0 %v2220_v36 }
  0xaa   : > { %868 = vperm.xlu0 %1525, %v1689_v15  }
  0xab   : > { %v1848_v55 = vpop.permute.xlu1 %368  ;;  %541 = vperm.xlu1 %1504, %v1651_v9   ;;  %v364_v56 = vpop.permute.xlu0 %363 }
  0xac   : > { %v389_v57 = vmul.f32 %v1829_v45, %v364_v56 }
  0xae   : > { %1527 = vset.pattern.permute.xlu0 %v2218_v2  ;;  %v378_v2 = vmul.f32 %v1829_v45, %v1797_v39 }
  0xaf   : > { %v1853_v58 = vpop.permute.xlu1 %414  ;;  %1505 = vset.pattern.permute.xlu1 %v2219_v34  ;;  %v1856_v59 = vpop.permute.xlu0 %409 }
  0xb0   : > { %735 = vperm.xlu1 %1505, %v1641_v7  }
  0xb3   : > { %v1859_v60 = vpop.permute.xlu1 %424  ;;  %v1861_v61 = vpop.permute.xlu0 %419 }
  0xb4   : > { %1506 = vset.pattern.permute.xlu1 %v2222_v35 }
  0xb5   : > { %638 = vperm.xlu1 %1506, %v1656_v10  }
  0xb7   : > { %v1865_v62 = vpop.permute.xlu1 %434  ;;  %v1867_v63 = vpop.permute.xlu0 %429 }
  0xb9   : > { %1507 = vset.pattern.permute.xlu1 %v2220_v36 }
  0xba   : > { %832 = vperm.xlu1 %1507, %v1646_v8  }
  0xbb   : > { %v1871_v0 = vpop.permute.xlu1 %444  ;;  %v1873_v1 = vpop.permute.xlu0 %439 }
  0xbe   : > { %836 = vperm.xlu1 %1507, %v1641_v7  }
  0xbf   : > { %v1876_v3 = vpop.permute.xlu1 %454  ;;  %v450_v4 = vpop.permute.xlu0 %449 }
  0xc0   : > { %v1878_v5 = vadd.f32 %v450_v4, %v383_v48  ;;  %v388_v48 = vmul.f32 %v1829_v45, %v1842_v52 }
  0xc2   : > { %1508 = vset.pattern.permute.xlu1 %v1545_v33 }
  0xc3   : > { %v1881_v6 = vpop.permute.xlu1 %464  ;;  %549 = vperm.xlu1 %1508, %v1665_v11   ;;  %v460_v17 = vpop.permute.xlu0 %459 }
  0xc4   : > { %v497_v18 = vadd.f32 %v460_v17, %v385_v51 }
  0xc7   : > { %v475_v8 = vpop.permute.xlu1 %474  ;;  %1509 = vset.pattern.permute.xlu1 %v2219_v34  ;;  %v470_v19 = vpop.permute.xlu0 %469 }
  0xc8   : > { %739 = vperm.xlu1 %1509, %v1656_v10   ;;  %v1886_v7 = vadd.f32 %v470_v19, %v387_v54  ;;  %v500_v54 = vadd.f32 %v475_v8, %v388_v48  ;;  %v375_v19 = vmul.f32 %v1829_v45, %v1792_v38 }
  0xcb   : > { %v1888_v20 = vpop.permute.xlu1 %484  ;;  %v480_v21 = vpop.permute.xlu0 %479 }
  0xcc   : > { %1510 = vset.pattern.permute.xlu1 %v2222_v35  ;;  %v1891_v22 = vadd.f32 %v480_v21, %v389_v57  ;;  %v1937_v21 = vld [vmem:[%s1823_s29 + $0x2] ss:$0 sm:$0xff] }
  0xcd   : > { %646 = vperm.xlu1 %1510, %v1670_v12  }
  0xce   : > { %2223 = vst [vmem:[#allocation3_spill] sm:$0xff] %v1891_v22 }
  0xd0   : > { %v510_v23 = vpop.permute.xlu1 %509  ;;  %v708_v24 = vpop.permute.xlu0 %707 }
  0xd1   : > { %650 = vperm.xlu1 %1510, %v1665_v11  }
  0xd4   : > { %v514_v25 = vpop.permute.xlu1 %513  ;;  %v1895_v26 = vpop.permute.xlu0 %719 }
  0xd5   : > { %1511 = vset.pattern.permute.xlu1 %v2220_v36 }
  0xd6   : > { %844 = vperm.xlu1 %1511, %v1651_v9  }
  0xd9   : > { %v611_v10 = vpop.permute.xlu1 %610  ;;  %v506_v27 = vpop.permute.xlu0 %505 }
  0xda   : > { %1512 = vset.pattern.permute.xlu1 %v1545_v33  ;;  %v674_v38 = vmul.f32 %v1937_v21, %v611_v10 }
  0xdb   : > { %553 = vperm.xlu1 %1512, %v1682_v14  }
  0xdd   : > { %v1901_v28 = vpop.permute.xlu0 %521 }
  0xde   : > { %v518_v29 = vpop.permute.xlu1 %517 }
  0xdf   : > { %1514 = vset.pattern.permute.xlu1 %v2219_v34  ;;  %v575_v10 = vmul.f32 %v1909_v32, %v518_v29 }
  0xe0   : > { %747 = vperm.xlu1 %1514, %v1670_v12  }
  0xe1   : > { %v1905_v30 = vpop.permute.xlu0 %533 }
  0xe3   : > { %v712_v31 = vpop.permute.xlu1 %711 }
  0xe4   : > { %751 = vperm.xlu1 %1514, %v1665_v11  }
  0xe5   : > { %v546_v9 = vpop.permute.xlu0 %545 }
  0xe6   : > { %v582_v47 = vmul.f32 %v1909_v32, %v546_v9 }
  0xe8   : > { %v1914_v50 = vadd.f32 %v582_v47, %v497_v18  ;;  %v615_v51 = vpop.permute.xlu1 %614  ;;  %1515 = vset.pattern.permute.xlu1 %v2222_v35  ;;  %v1943_v47 = vld [vmem:[%s1823_s29 + $0x3] ss:$0 sm:$0xff] }
  0xe9   : > { %658 = vperm.xlu1 %1515, %v1677_v13   ;;  %v558_v53 = vpop.permute.xlu0 %557 }
  0xea   : > { %v585_v11 = vmul.f32 %v1909_v32, %v558_v53 }
  0xec   : > { %v1919_v56 = vadd.f32 %v585_v11, %v500_v54  ;;  %v487_v54 = vadd.f32 %v1856_v59, %v375_v19  ;;  %v574_v11 = vmul.f32 %v1909_v32, %v514_v25  ;;  %v774_v59 = vmul.f32 %v1943_v47, %v708_v24  ;;  %v1962_v19 = vld [vmem:[%s1823_s29 + $0x4] ss:$0 sm:$0xff] }
  0xed   : > { %1516 = vset.pattern.permute.xlu1 %v2220_v36  ;;  %v809_v57 = vpop.permute.xlu1 %808  ;;  %v775_v36 = vmul.f32 %v1943_v47, %v712_v31 }
  0xee   : > { %848 = vperm.xlu1 %1516, %v1670_v12   ;;  %v817_v52 = vpop.permute.xlu0 %816  ;;  %v376_v12 = vmul.f32 %v1829_v45, %v1800_v40  ;;  %v572_v40 = vmul.f32 %v1909_v32, %v506_v27  ;;  %v675_v27 = vmul.f32 %v1937_v21, %v615_v51 }
  0xf0   : > { %v488_v53 = vadd.f32 %v1853_v58, %v376_v12  ;;  %v588_v35 = vadd.f32 %v572_v40, %v487_v54  ;;  %v875_v54 = vmul.f32 %v1962_v19, %v809_v57 }
  0xf1   : > { %v813_v4 = vpop.permute.xlu1 %812 }
  0xf2   : > { %1518 = vset.pattern.permute.xlu1 %v1545_v33  ;;  %v1924_v17 = vpop.permute.xlu0 %828  ;;  %v573_v33 = vmul.f32 %v1909_v32, %v510_v23  ;;  %v377_v23 = vmul.f32 %v1829_v45, %v1789_v37  ;;  %v876_v25 = vmul.f32 %v1962_v19, %v813_v4 }
  0xf3   : > { %561 = vperm.xlu1 %1518, %v1694_v16  }
  0xf4   : > { %v489_v58 = vadd.f32 %v1861_v61, %v377_v23  ;;  %v490_v61 = vadd.f32 %v1859_v60, %v378_v2  ;;  %v777_v2 = vmul.f32 %v1943_v47, %v1895_v26  ;;  %v2225_v60 = vmov 4  }
  0xf6   : > { %v1927_v18 = vpop.permute.xlu1 %525  ;;  %v1929_v8 = vpop.permute.xlu0 %840  ;;  %v591_v23 = vadd.f32 %v575_v10, %v490_v61  ;;  %v380_v61 = vmul.f32 %v1829_v45, %v1808_v41  ;;  %v576_v41 = vmul.f32 %v1909_v32, %v1901_v28  ;;  %v1529_v28 = vld [vmem:[%s2213_s3 + $0x20] sm:$0xff]  }
  0xf7   : > { %565 = vperm.xlu1 %1518, %v1689_v15   ;;  %1449 = vmatprep.mubr.bf16.mxu1 %v1529_v28 }
  0xfa   : > { %v1940_v9 = vpop.permute.xlu0 %852 }
  0xfb   : > { %1519 = vset.pattern.permute.xlu1 %v2219_v34  ;;  %v716_v48 = vpop.permute.xlu1 %715  ;;  %v589_v34 = vadd.f32 %v573_v33, %v488_v53  ;;  %v2224_v33 = vmov 2   ;;  %v590_v53 = vadd.f32 %v574_v11, %v489_v58 }
  0xfc   : > { %759 = vperm.xlu1 %1519, %v1677_v13   ;;  %v776_v29 = vmul.f32 %v1943_v47, %v716_v48 }
  0xfd   : > { %v690_v37 = vadd.f32 %v674_v38, %v589_v34  ;;  %v691_v22 = vadd.f32 %v675_v27, %v590_v53  ;;  %v379_v53 = vmul.f32 %v1829_v45, %v1810_v42 }
  0xff   : > { %v607_v12 = vpop.permute.xlu0 %606  ;;  %v791_v24 = vadd.f32 %v775_v36, %v690_v37  ;;  %v877_v36 = vmul.f32 %v1962_v19, %v817_v52  ;;  %v792_v11 = vadd.f32 %v776_v29, %v691_v22 }
 0x100   : > { %v673_v39 = vmul.f32 %v1937_v21, %v607_v12  ;;  %1520 = vset.pattern.permute.xlu1 %v2224_v33  ;;  %v623_v31 = vpop.permute.xlu1 %622 }
 0x101   : > { %662 = vperm.xlu1 %1520, %v1694_v16   ;;  %v892_v4 = vadd.f32 %v876_v25, %v791_v24  ;;  %v893_v27 = vadd.f32 %v877_v36, %v792_v11  ;;  %v577_v24 = vmul.f32 %v1909_v32, %v1927_v18  ;;  %v950_v36 = vld [vmem:[%s2214_s4 + $0x18] sm:$0xff] }
 0x102   : > { %v689_v51 = vadd.f32 %v673_v39, %v588_v35  ;;  %v2226_v39 = vmov 3  }
 0x103   : > { %v619_v34 = vpop.permute.xlu0 %618  ;;  %v908_v58 = vmax.f32 %v892_v4, 0.0  ;;  %v909_v22 = vmax.f32 %v893_v27, 0.0  ;;  %v677_v4 = vmul.f32 %v1937_v21, %v623_v31 }
 0x104   : > { %v790_v38 = vadd.f32 %v774_v59, %v689_v51  ;;  %v676_v40 = vmul.f32 %v1937_v21, %v619_v34  ;;  %v627_v12 = vpop.permute.xlu1 %626  ;;  %v492_v51 = vadd.f32 %v1865_v62, %v380_v61  ;;  %v2227_v34 = vmov 0   ;;  %v952_v61 = vld [vmem:[%s2214_s4 + $0x28] sm:$0xff] }
 0x105   : > { %1522 = vset.pattern.permute.xlu1 %v2225_v60 }
 0x106   : > { %v891_v48 = vadd.f32 %v875_v54, %v790_v38  ;;  %v692_v35 = vadd.f32 %v676_v40, %v591_v23  ;;  %856 = vperm.xlu1 %1522, %v1682_v14   ;;  %v678_v23 = vmul.f32 %v1937_v21, %v627_v12  ;;  %v593_v42 = vadd.f32 %v577_v24, %v492_v51  ;;  %v948_v54 = vld [vmem:[%s2214_s4 + $0x8] sm:$0xff]  ;;  %v953_v24 = vld [vmem:[%s2214_s4 + $0x30] sm:$0xff] }
 0x107   : > { %v631_v40 = vpop.permute.xlu0 %630 }
 0x108   : > { %v907_v10 = vmax.f32 %v891_v48, 0.0  ;;  %v793_v59 = vadd.f32 %v777_v2, %v692_v35  ;;  %v694_v62 = vadd.f32 %v678_v23, %v593_v42  ;;  %v880_v2 = vmul.f32 %v1962_v19, %v1924_v17  ;;  %v949_v48 = vld [vmem:[%s2214_s4 + $0x10] sm:$0xff] }
 0x109   : > { %v821_v57 = vpop.permute.xlu1 %820  ;;  %975 = vperm.xlu0 %1527, %v949_v48   ;;  %v381_v23 = vmul.f32 %v1829_v45, %v1818_v44  ;;  %v382_v44 = vmul.f32 %v1829_v45, %v1816_v43 }
 0x10a   : > { %v878_v37 = vmul.f32 %v1962_v19, %v821_v57  ;;  %860 = vperm.xlu1 %1522, %v1677_v13   ;;  %v939_v25 = vpack.c.bf16 %v908_v58, %v907_v10  ;;  %v951_v57 = vld [vmem:[%s2214_s4 + $0x20] sm:$0xff] }
 0x10b   : > { %v2026_v27 = vpop.permute.xlu0 %642  ;;  %v493_v42 = vadd.f32 %v1873_v1, %v381_v23  ;;  %v1209_v1 = vld [vmem:[%s2215_s5 + $0x28] sm:$0xff]  ;;  %v494_v28 = vadd.f32 %v1871_v0, %v382_v44  ;;  %v1210_v0 = vld [vmem:[%s2215_s5 + $0x30] sm:$0xff] }
 0x10c   : > { %v894_v26 = vadd.f32 %v878_v37, %v793_v59  ;;  %1425 = vmatprep.subr.bf16.mxu0 %v939_v25  ;;  %1457 = vmatprep.subr.bf16.mxu1 %v939_v25 }
 0x10d   : > { %1426 = vmatpush3.bf16.msra.mxu0 %v939_v25  ;;  %1465 = vmatpush3.bf16.msra.mxu1 %v939_v25 }
 0x10e   : > { %v910_v52 = vmax.f32 %v894_v26, 0.0  ;;  %1523 = vset.pattern.permute.xlu1 %v2226_v39  ;;  %v1980_v14 = vpop.permute.xlu1 %529  ;;  %v1204_v39 = vld [vmem:[%s2215_s5] sm:$0xff] }
 0x10f   : > { %767 = vperm.xlu1 %1523, %v1689_v15   ;;  %v947_v15 = vld [vmem:[%s2214_s4] sm:$0xff]  ;;  %1222 = vperm.xlu0 %1527, %v1204_v39   ;;  %v958_v39 = vld [vmem:[%s2214_s4 + $0x58] sm:$0xff] }
 0x110   : > { %v940_v33 = vpack.c.bf16 %v910_v52, %v909_v22  ;;  %v1205_v22 = vld [vmem:[%s2215_s5 + $0x8] sm:$0xff] }
 0x112   : > { %1427 = vmatprep.subr.bf16.mxu0 %v940_v33  ;;  %1458 = vmatprep.subr.bf16.mxu1 %v940_v33 }
 0x113   : > { %1524 = vset.pattern.permute.xlu1 %v2225_v60  ;;  %v724_v13 = vpop.permute.xlu1 %723  ;;  %1428 = vmatpush3.bf16.msra.mxu0 %v940_v33 }
 0x114   : > { %1466 = vmatpush3.bf16.msra.mxu1 %v940_v33  ;;  %864 = vperm.xlu1 %1524, %v1694_v16   ;;  %v491_v16 = vadd.f32 %v1867_v63, %v379_v53  ;;  %v1528_v63 = vld [vmem:[%s2213_s3] sm:$0xff]   ;;  %v778_v60 = vmul.f32 %v1943_v47, %v724_v13  ;;  %v2034_v33 = vpop.permute.xlu0 %654  ;;  %v1206_v53 = vld [vmem:[%s2215_s5 + $0x10] sm:$0xff] }
 0x115   : > { %1441 = vmatprep.mubr.bf16.mxu0 %v1528_v63  ;;  %1232 = vperm.xlu0 %1527, %v1206_v53   ;;  %v955_v63 = vld [vmem:[%s2214_s4 + $0x40] sm:$0xff] }
 0x116   : > { %v592_v12 = vadd.f32 %v576_v41, %v491_v16  ;;  %v954_v16 = vld [vmem:[%s2214_s4 + $0x38] sm:$0xff]  ;;  %v1208_v41 = vld [vmem:[%s2215_s5 + $0x20] sm:$0xff] }
 0x117   : > { %v728_v29 = vpop.permute.xlu1 %727 }
 0x118   : > { %1526 = vset.pattern.permute.xlu1 %v2227_v34  ;;  %v779_v18 = vmul.f32 %v1943_v47, %v728_v29  ;;  %v693_v11 = vadd.f32 %v677_v4, %v592_v12  ;;  %v2050_v29 = vpop.permute.xlu0 %666  ;;  %v578_v34 = vmul.f32 %v1909_v32, %v1980_v14  ;;  %v579_v14 = vmul.f32 %v1909_v32, %v1905_v30 }
 0x119   : > { %965 = vperm.xlu1 %1526, %v947_v15   ;;  %v1207_v15 = vld [vmem:[%s2215_s5 + $0x18] sm:$0xff]  ;;  %v679_v4 = vmul.f32 %v1937_v21, %v631_v40 }
 0x11a   : > { %v795_v31 = vadd.f32 %v779_v18, %v694_v62  ;;  %v794_v58 = vadd.f32 %v778_v60, %v693_v11  ;;  %1237 = vperm.xlu0 %1527, %v1207_v15   ;;  %v594_v62 = vadd.f32 %v578_v34, %v493_v42  ;;  %v595_v30 = vadd.f32 %v579_v14, %v494_v28 }
 0x11b   : > { %v883_v34 = vmul.f32 %v1962_v19, %v1929_v8  ;;  %v1214_v8 = vld [vmem:[%s2215_s5 + $0x50] sm:$0xff] }
 0x11c   : > { %v2005_v38 = vpop.permute.xlu1 %634  ;;  %v896_v10 = vadd.f32 %v880_v2, %v795_v31  ;;  %v695_v40 = vadd.f32 %v679_v4, %v594_v62 }
 0x11d   : > { %970 = vperm.xlu1 %1526, %v948_v54   ;;  %v732_v54 = vpop.permute.xlu0 %731  ;;  %v680_v43 = vmul.f32 %v1937_v21, %v2005_v38 }
 0x11e   : > { %v912_v37 = vmax.f32 %v896_v10, 0.0  ;;  %1242 = vperm.xlu0 %1527, %v1208_v41   ;;  %v780_v12 = vmul.f32 %v1943_v47, %v732_v54  ;;  %v960_v54 = vld [vmem:[%s2214_s4 + $0x68] sm:$0xff] }
 0x11f   : > { %v696_v48 = vadd.f32 %v680_v43, %v595_v30  ;;  %v1216_v43 = vld [vmem:[%s2215_s5 + $0x60] sm:$0xff] }
 0x120   : > { %v796_v11 = vadd.f32 %v780_v12, %v695_v40 }
 0x121   : > { %v825_v35 = vpop.permute.xlu1 %824  ;;  %980 = vperm.xlu1 %1526, %v950_v36   ;;  %v956_v36 = vld [vmem:[%s2214_s4 + $0x48] sm:$0xff] }
 0x122   : > { %v879_v17 = vmul.f32 %v1962_v19, %v825_v35  ;;  %1247 = vperm.xlu0 %1527, %v1209_v1   ;;  %v744_v1 = vpop.permute.xlu0 %743 }
 0x123   : > { %v783_v12 = vmul.f32 %v1943_v47, %v744_v1 }
 0x124   : > { %v895_v59 = vadd.f32 %v879_v17, %v794_v58  ;;  %v957_v17 = vld [vmem:[%s2214_s4 + $0x50] sm:$0xff] }
 0x125   : > { %985 = vperm.xlu1 %1526, %v951_v57   ;;  %v1211_v57 = vld [vmem:[%s2215_s5 + $0x38] sm:$0xff] }
 0x126   : > { %v911_v25 = vmax.f32 %v895_v59, 0.0  ;;  %v538_v26 = vpop.permute.xlu1 %537  ;;  %1252 = vperm.xlu0 %1527, %v1210_v0  }
 0x128   : > { %v941_v52 = vpack.c.bf16 %v912_v37, %v911_v25  ;;  %v580_v37 = vmul.f32 %v1909_v32, %v538_v26  ;;  %v959_v26 = vld [vmem:[%s2214_s4 + $0x60] sm:$0xff] }
 0x129   : > { %1227 = vperm.xlu1 %1526, %v1205_v22  }
 0x12a   : > { %v2036_v13 = vpop.permute.xlu1 %541  ;;  %1429 = vmatprep.subr.bf16.mxu0 %v941_v52  ;;  %1459 = vmatprep.subr.bf16.mxu1 %v941_v52  ;;  %v596_v15 = vadd.f32 %v580_v37, %v1878_v5  ;;  %v384_v5 = vmul.f32 %v1829_v45, %v1831_v46  ;;  %v682_v46 = vmul.f32 %v1937_v21, %v2026_v27  ;;  %v962_v27 = vld [vmem:[%s2214_s4 + $0x78] sm:$0xff] }
 0x12b   : > { %1430 = vmatpush3.bf16.msra.mxu0 %v941_v52  ;;  %1467 = vmatpush3.bf16.msra.mxu1 %v941_v52  ;;  %v581_v42 = vmul.f32 %v1909_v32, %v2036_v13  ;;  %v961_v13 = vld [vmem:[%s2214_s4 + $0x70] sm:$0xff] }
 0x12c   : > { %1257 = vperm.xlu0 %1527, %v1211_v57   ;;  %v496_v44 = vadd.f32 %v1876_v3, %v384_v5  ;;  %v386_v57 = vmul.f32 %v1829_v45, %v1837_v49  ;;  %v886_v49 = vmul.f32 %v1962_v19, %v1940_v9  ;;  %v390_v9 = vmul.f32 %v1829_v45, %v1848_v55 }
 0x12d   : > { %990 = vperm.xlu1 %1526, %v952_v61   ;;  %v1212_v61 = vld [vmem:[%s2215_s5 + $0x40] sm:$0xff] }
 0x12e   : > { %v597_v62 = vadd.f32 %v581_v42, %v496_v44  ;;  %v502_v44 = vadd.f32 %v1888_v20, %v390_v9 }
 0x12f   : > { %v736_v51 = vpop.permute.xlu1 %735 }
 0x130   : > { %v781_v60 = vmul.f32 %v1943_v47, %v736_v51  ;;  %1262 = vperm.xlu0 %1527, %v1212_v61   ;;  %v1213_v51 = vld [vmem:[%s2215_s5 + $0x48] sm:$0xff]  ;;  %v698_v3 = vadd.f32 %v682_v46, %v597_v62 }
 0x131   : > { %995 = vperm.xlu1 %1526, %v953_v24  }
 0x132   : > { %v797_v35 = vadd.f32 %v781_v60, %v696_v48  ;;  %v799_v30 = vadd.f32 %v783_v12, %v698_v3  ;;  %v1218_v60 = vld [vmem:[%s2215_s5 + $0x70] sm:$0xff] }
 0x134   : > { %v639_v18 = vpop.permute.xlu1 %638  ;;  %1267 = vperm.xlu0 %1527, %v1213_v51  }
 0x135   : > { %1000 = vperm.xlu1 %1526, %v954_v16   ;;  %v681_v53 = vmul.f32 %v1937_v21, %v639_v18 }
 0x137   : > { %v697_v16 = vadd.f32 %v681_v53, %v596_v15 }
 0x138   : > { %1272 = vperm.xlu0 %1527, %v1214_v8  }
 0x139   : > { %v833_v2 = vpop.permute.xlu1 %832  ;;  %1005 = vperm.xlu1 %1526, %v955_v63   ;;  %v1215_v63 = vld [vmem:[%s2215_s5 + $0x58] sm:$0xff] }
 0x13a   : > { %v881_v31 = vmul.f32 %v1962_v19, %v833_v2 }
 0x13c   : > { %v897_v58 = vadd.f32 %v881_v31, %v796_v11  ;;  %1277 = vperm.xlu0 %1527, %v1215_v63   ;;  %v1217_v31 = vld [vmem:[%s2215_s5 + $0x68] sm:$0xff]  ;;  %v756_v63 = vpop.permute.xlu0 %755 }
 0x13d   : > { %v837_v38 = vpop.permute.xlu1 %836  ;;  %1010 = vperm.xlu1 %1526, %v956_v36   ;;  %v786_v1 = vmul.f32 %v1943_v47, %v756_v63 }
 0x13e   : > { %v882_v10 = vmul.f32 %v1962_v19, %v837_v38  ;;  %v913_v25 = vmax.f32 %v897_v58, 0.0  ;;  %v1219_v38 = vld [vmem:[%s2215_s5 + $0x78] sm:$0xff] }
 0x140   : > { %v898_v59 = vadd.f32 %v882_v10, %v797_v35  ;;  %1282 = vperm.xlu0 %1527, %v1216_v43   ;;  %v685_v35 = vmul.f32 %v1937_v21, %v2034_v33 }
 0x141   : > { %1015 = vperm.xlu1 %1526, %v957_v17  }
 0x142   : > { %v914_v22 = vmax.f32 %v898_v59, 0.0  ;;  %v550_v52 = vpop.permute.xlu1 %549 }
 0x143   : > { %v583_v59 = vmul.f32 %v1909_v32, %v550_v52 }
 0x144   : > { %v942_v24 = vpack.c.bf16 %v914_v22, %v913_v25  ;;  %1287 = vperm.xlu0 %1527, %v1217_v31   ;;  %v498_v22 = vadd.f32 %v1881_v6, %v386_v57 }
 0x145   : > { %1020 = vperm.xlu1 %1526, %v958_v39  }
 0x146   : > { %1431 = vmatprep.subr.bf16.mxu0 %v942_v24  ;;  %1460 = vmatprep.subr.bf16.mxu1 %v942_v24  ;;  %v599_v39 = vadd.f32 %v583_v59, %v498_v22 }
 0x147   : > { %v740_v23 = vpop.permute.xlu1 %739  ;;  %1432 = vmatpush3.bf16.msra.mxu0 %v942_v24  ;;  %1468 = vmatpush3.bf16.msra.mxu1 %v942_v24 }
 0x148   : > { %v782_v41 = vmul.f32 %v1943_v47, %v740_v23  ;;  %1297 = vperm.xlu0 %1527, %v1219_v38  }
 0x149   : > { %1025 = vperm.xlu1 %1526, %v959_v26  }
 0x14a   : > { %v798_v18 = vadd.f32 %v782_v41, %v697_v16 }
 0x14c   : > { %v899_v14 = vadd.f32 %v883_v34, %v798_v18  ;;  %v647_v4 = vpop.permute.xlu1 %646 }
 0x14d   : > { %1030 = vperm.xlu1 %1526, %v960_v54   ;;  %v683_v52 = vmul.f32 %v1937_v21, %v647_v4 }
 0x14e   : > { %v915_v0 = vmax.f32 %v899_v14, 0.0 }
 0x14f   : > { %v699_v23 = vadd.f32 %v683_v52, %v1914_v50  ;;  %v688_v50 = vmul.f32 %v1937_v21, %v2050_v29 }
 0x150   : > { %v651_v28 = vpop.permute.xlu1 %650 }
 0x151   : > { %1035 = vperm.xlu1 %1526, %v961_v13   ;;  %v684_v33 = vmul.f32 %v1937_v21, %v651_v28 }
 0x153   : > { %v700_v53 = vadd.f32 %v684_v33, %v599_v39 }
 0x155   : > { %v845_v2 = vpop.permute.xlu1 %844  ;;  %1040 = vperm.xlu1 %1526, %v962_v27   ;;  %v764_v27 = vpop.permute.xlu0 %763 }
 0x156   : > { %v884_v40 = vmul.f32 %v1962_v19, %v845_v2 }
 0x158   : > { %v900_v36 = vadd.f32 %v884_v40, %v799_v30 }
 0x159   : > { %1292 = vperm.xlu1 %1526, %v1218_v60  }
 0x15a   : > { %v916_v11 = vmax.f32 %v900_v36, 0.0  ;;  %v554_v48 = vpop.permute.xlu1 %553  ;;  %v869_v36 = vpop.permute.xlu0 %868 }
 0x15b   : > { %v584_v58 = vmul.f32 %v1909_v32, %v554_v48 }
 0x15c   : > { %v943_v10 = vpack.c.bf16 %v916_v11, %v915_v0  ;;  %v2228_v0 = vld [vmem:[#allocation3_spill] sm:$0xff] }
 0x15d   : > { %v600_v17 = vadd.f32 %v584_v58, %v1886_v7 }
 0x15e   : > { %1433 = vmatprep.subr.bf16.mxu0 %v943_v10  ;;  %1461 = vmatprep.subr.bf16.mxu1 %v943_v10 }
 0x15f   : > { %v701_v37 = vadd.f32 %v685_v35, %v600_v17  ;;  %v748_v25 = vpop.permute.xlu1 %747  ;;  %1434 = vmatpush3.bf16.msra.mxu0 %v943_v10  ;;  %1469 = vmatpush3.bf16.msra.mxu1 %v943_v10  ;;  %v788_v10 = vmul.f32 %v1943_v47, %v764_v27 }
 0x160   : > { %v784_v51 = vmul.f32 %v1943_v47, %v748_v25 }
 0x161   : > { %v802_v3 = vadd.f32 %v786_v1, %v701_v37 }
 0x162   : > { %v800_v34 = vadd.f32 %v784_v51, %v699_v23 }
 0x163   : > { %v752_v61 = vpop.permute.xlu1 %751 }
 0x164   : > { %v785_v7 = vmul.f32 %v1943_v47, %v752_v61 }
 0x166   : > { %v801_v24 = vadd.f32 %v785_v7, %v700_v53  ;;  %v1531_v53 = vld [vmem:[%s2213_s3 + $0x28] sm:$0xff]   ;;  %v1533_v7 = vld [vmem:[%s2213_s3 + $0x30] sm:$0xff]  }
 0x168   : > { %v902_v15 = vadd.f32 %v886_v49, %v801_v24  ;;  %v659_v26 = vpop.permute.xlu1 %658  ;;  %v1534_v49 = vld [vmem:[%s2213_s3 + $0x18] sm:$0xff]  }
 0x169   : > { %v686_v45 = vmul.f32 %v1937_v21, %v659_v26  ;;  %v1535_v24 = vld [vmem:[%s2213_s3 + $0x38] sm:$0xff]  }
 0x16a   : > { %v918_v5 = vmax.f32 %v902_v15, 0.0 }
 0x16b   : > { %v702_v12 = vadd.f32 %v686_v45, %v1919_v56 }
 0x16d   : > { %v849_v6 = vpop.permute.xlu1 %848 }
 0x16e   : > { %v885_v16 = vmul.f32 %v1962_v19, %v849_v6 }
 0x170   : > { %v901_v41 = vadd.f32 %v885_v16, %v800_v34 }
 0x172   : > { %v917_v42 = vmax.f32 %v901_v41, 0.0  ;;  %v562_v18 = vpop.permute.xlu1 %561 }
 0x173   : > { %v586_v29 = vmul.f32 %v1909_v32, %v562_v18 }
 0x174   : > { %v944_v54 = vpack.c.bf16 %v918_v5, %v917_v42 }
 0x175   : > { %v602_v11 = vadd.f32 %v586_v29, %v2228_v0 }
 0x176   : > { %v566_v8 = vpop.permute.xlu1 %565  ;;  %1435 = vmatprep.subr.bf16.mxu0 %v944_v54  ;;  %1462 = vmatprep.subr.bf16.mxu1 %v944_v54 }
 0x177   : > { %v587_v14 = vmul.f32 %v1909_v32, %v566_v8  ;;  %1436 = vmatpush3.bf16.msra.mxu0 %v944_v54  ;;  %1470 = vmatpush3.bf16.msra.mxu1 %v944_v54  ;;  %v890_v32 = vmul.f32 %v1962_v19, %v869_v36 }
 0x179   : > { %v603_v4 = vadd.f32 %v587_v14, %v502_v44 }
 0x17b   : > { %v760_v46 = vpop.permute.xlu1 %759  ;;  %v704_v62 = vadd.f32 %v688_v50, %v603_v4 }
 0x17c   : > { %v787_v28 = vmul.f32 %v1943_v47, %v760_v46 }
 0x17e   : > { %v803_v2 = vadd.f32 %v787_v28, %v702_v12 }
 0x180   : > { %v663_v13 = vpop.permute.xlu1 %662 }
 0x181   : > { %v687_v60 = vmul.f32 %v1937_v21, %v663_v13 }
 0x183   : > { %v703_v56 = vadd.f32 %v687_v60, %v602_v11 }
 0x185   : > { %v857_v55 = vpop.permute.xlu1 %856  ;;  %v804_v21 = vadd.f32 %v788_v10, %v703_v56 }
 0x186   : > { %v887_v20 = vmul.f32 %v1962_v19, %v857_v55 }
 0x188   : > { %v903_v30 = vadd.f32 %v887_v20, %v802_v3  ;;  %v976_v51 = vpop.permute.xlu0 %975 }
 0x189   : > { %v861_v43 = vpop.permute.xlu1 %860 }
 0x18a   : > { %v888_v40 = vmul.f32 %v1962_v19, %v861_v43  ;;  %v919_v48 = vmax.f32 %v903_v30, 0.0 }
 0x18c   : > { %v904_v31 = vadd.f32 %v888_v40, %v803_v2 }
 0x18e   : > { %v920_v38 = vmax.f32 %v904_v31, 0.0  ;;  %v768_v35 = vpop.permute.xlu1 %767  ;;  %v1223_v6 = vpop.permute.xlu0 %1222 }
 0x18f   : > { %v789_v58 = vmul.f32 %v1943_v47, %v768_v35  ;;  %v1530_v47 = vld [vmem:[%s2213_s3 + $0x8] sm:$0xff]  }
 0x190   : > { %v945_v17 = vpack.c.bf16 %v920_v38, %v919_v48 }
 0x191   : > { %v805_v57 = vadd.f32 %v789_v58, %v704_v62 }
 0x192   : > { %1437 = vmatprep.subr.bf16.mxu0 %v945_v17  ;;  %1463 = vmatprep.subr.bf16.mxu1 %v945_v17 }
 0x193   : > { %v865_v59 = vpop.permute.xlu1 %864  ;;  %1438 = vmatpush3.bf16.msra.mxu0 %v945_v17  ;;  %1471 = vmatpush3.bf16.msra.mxu1 %v945_v17  ;;  %v906_v37 = vadd.f32 %v890_v32, %v805_v57 }
 0x194   : > { %v889_v25 = vmul.f32 %v1962_v19, %v865_v59  ;;  %v1532_v19 = vld [vmem:[%s2213_s3 + $0x10] sm:$0xff]   ;;  %v1233_v16 = vpop.permute.xlu0 %1232 }
 0x195   : > { %v922_v33 = vmax.f32 %v906_v37, 0.0 }
 0x196   : > { %v905_v22 = vadd.f32 %v889_v25, %v804_v21 }
 0x198   : > { %v921_v39 = vmax.f32 %v905_v22, 0.0  ;;  %v966_v52 = vpop.permute.xlu1 %965 }
 0x199   : > { %v1238_v5 = vpop.permute.xlu0 %1237 }
 0x19a   : > { %v946_v61 = vpack.c.bf16 %v922_v33, %v921_v39 }
 0x19c   : > { %1439 = vmatprep.subr.bf16.mxu0 %v946_v61  ;;  %1464 = vmatprep.subr.bf16.mxu1 %v946_v61  ;;  %v971_v15 = vpop.permute.xlu1 %970 }
 0x19d   : > { %1440 = vmatpush3.bf16.msra.mxu0 %v946_v61  ;;  %1472 = vmatpush3.bf16.msra.mxu1 %v946_v61  ;;  %v1243_v18 = vpop.permute.xlu0 %1242 }
 0x1a0   : > { %1442 = vmatmul.mubr.bf16.vlgmr.msra.gmra.mrb[0].mxu0 %v1530_v47  ;;  %1450 = vmatmul.mubr.bf16.vlgmr.msra.gmra.mrb[0].mxu1 %v1531_v53  ;;  %v981_v26 = vpop.permute.xlu1 %980 }
 0x1a1   : > { %1445 = vmatprep.mubr.bf16.mxu0 %v1532_v19  ;;  %1453 = vmatprep.mubr.bf16.mxu1 %v1533_v7  ;;  %v1248_v9 = vpop.permute.xlu0 %1247 }
 0x1a4   : > { %v986_v23 = vpop.permute.xlu1 %985 }
 0x1a5   : > { %v1253_v44 = vpop.permute.xlu0 %1252 }
 0x1a8   : > { %1446 = vmatmul.mubr.bf16.gmra.mrb[4].mxu0 %v1534_v49  ;;  %1454 = vmatmul.mubr.bf16.gmra.mrb[4].mxu1 %v1535_v24  ;;  %v1228_v34 = vpop.permute.xlu1 %1227 }
 0x1ab   : > { %v1258_v50 = vpop.permute.xlu0 %1257 }
 0x1ac   : > { %v991_v41 = vpop.permute.xlu1 %990 }
 0x1af   : > { %v1263_v46 = vpop.permute.xlu0 %1262 }
 0x1b0   : > { %v996_v42 = vpop.permute.xlu1 %995 }
 0x1b3   : > { %v2200_v13 = vpop.permute.xlu0 %1267 }
 0x1b4   : > { %v1001_v54 = vpop.permute.xlu1 %1000 }
 0x1b7   : > { %v1273_v36 = vpop.permute.xlu0 %1272 }
 0x1b8   : > { %v1006_v8 = vpop.permute.xlu1 %1005 }
 0x1bc   : > { %v1011_v14 = vpop.permute.xlu1 %1010 }
 0x1c0   : > { %v1016_v4 = vpop.permute.xlu1 %1015 }
 0x1c4   : > { %v1021_v62 = vpop.permute.xlu1 %1020 }
 0x1c8   : > { %v1026_v31 = vpop.permute.xlu1 %1025 }
 0x273   : > { %v1443_v63 = vpop.f32.mrb[0].mxu0  ;;  %v1451_v1 = vpop.f32.mrb[0].mxu1 }
 0x274   : > { %v1125_v45 = vpop.f32.mrb[1].mxu0  ;;  %v1157_v55 = vpop.f32.mrb[1].mxu1  ;;  %v1134_v28 = vadd.f32 %v1443_v63, %v976_v51 }
 0x275   : > { %v1126_v20 = vadd.f32 %v1125_v45, %v966_v52  ;;  %v1444_v3 = vpop.f32.mrb[2].mxu0  ;;  %v1452_v12 = vpop.f32.mrb[2].mxu1  ;;  %v1158_v53 = vadd.f32 %v1157_v55, %v1006_v8 }
 0x276   : > { %v1137_v27 = vadd.f32 %v1444_v3, %v981_v26  ;;  %v1128_v43 = vpop.f32.mrb[3].mxu0  ;;  %v1160_v29 = vpop.f32.mrb[3].mxu1  ;;  %v1190_v40 = vmax.f32 %v1134_v28, 0.0  ;;  %v1169_v63 = vadd.f32 %v1452_v12, %v1021_v62 }
 0x277   : > { %v1188_v2 = vmax.f32 %v1126_v20, 0.0  ;;  %v1129_v30 = vadd.f32 %v1128_v43, %v971_v15  ;;  %v1031_v52 = vpop.permute.xlu1 %1030  ;;  %v1161_v15 = vadd.f32 %v1160_v29, %v1011_v14 }
 0x278   : > { %v1191_v0 = vmax.f32 %v1137_v27, 0.0  ;;  %v1302_v10 = vmul.f32 %v1233_v16, %v1190_v40  ;;  %v1196_v16 = vmax.f32 %v1158_v53, 0.0  ;;  %v1199_v27 = vmax.f32 %v1169_v63, 0.0 }
 0x279   : > { %v1189_v60 = vmax.f32 %v1129_v30, 0.0  ;;  %v1300_v11 = vmul.f32 %v1223_v6, %v1188_v2  ;;  %v1197_v45 = vmax.f32 %v1161_v15, 0.0 }
 0x27a   : > { %v1303_v37 = vmul.f32 %v1238_v5, %v1191_v0  ;;  %v1308_v55 = vmul.f32 %v1263_v46, %v1196_v16 }
 0x27b   : > { %v1301_v48 = vmul.f32 %v1228_v34, %v1189_v60  ;;  %v1447_v38 = vpop.f32.mrb[4].mxu0  ;;  %v1455_v35 = vpop.f32.mrb[4].mxu1  ;;  %v1166_v34 = vadd.f32 %v1451_v1, %v1016_v4  ;;  %v1309_v14 = vmul.f32 %v2200_v13, %v1197_v45 }
 0x27c   : > { %v1141_v58 = vpop.f32.mrb[5].mxu0  ;;  %v1173_v56 = vpop.f32.mrb[5].mxu1  ;;  %v1150_v32 = vadd.f32 %v1447_v38, %v996_v42 }
 0x27d   : > { %v1316_v17 = vadd.f32 %v1301_v48, %v1300_v11  ;;  %v1142_v57 = vadd.f32 %v1141_v58, %v986_v23  ;;  %v1448_v59 = vpop.f32.mrb[6].mxu0  ;;  %v1456_v21 = vpop.f32.mrb[6].mxu1  ;;  %v1198_v8 = vmax.f32 %v1166_v34, 0.0 }
 0x27e   : > { %v1144_v25 = vpop.f32.mrb[7].mxu0  ;;  %v1176_v22 = vpop.f32.mrb[7].mxu1  ;;  %v1153_v61 = vadd.f32 %v1448_v59, %v1001_v54  ;;  %v1194_v19 = vmax.f32 %v1150_v32, 0.0 }
 0x27f   : > { %v1317_v33 = vadd.f32 %v1316_v17, %v1302_v10  ;;  %v1192_v39 = vmax.f32 %v1142_v57, 0.0  ;;  %v1145_v47 = vadd.f32 %v1144_v25, %v991_v41  ;;  %v1278_v23 = vpop.permute.xlu0 %1277  ;;  %v1036_v41 = vpop.permute.xlu1 %1035  ;;  %v1310_v29 = vmul.f32 %v1273_v36, %v1198_v8 }
 0x280   : > { %v1195_v51 = vmax.f32 %v1153_v61, 0.0  ;;  %v1306_v5 = vmul.f32 %v1253_v44, %v1194_v19  ;;  %v1182_v4 = vadd.f32 %v1455_v35, %v1036_v41  ;;  %v1311_v62 = vmul.f32 %v1278_v23, %v1199_v27 }
 0x281   : > { %v1304_v7 = vmul.f32 %v1243_v18, %v1192_v39  ;;  %v1318_v49 = vadd.f32 %v1317_v33, %v1303_v37  ;;  %v1193_v24 = vmax.f32 %v1145_v47, 0.0  ;;  %v1174_v18 = vadd.f32 %v1173_v56, %v1026_v31 }
 0x282   : > { %v1307_v28 = vmul.f32 %v1258_v50, %v1195_v51  ;;  %v1202_v60 = vmax.f32 %v1182_v4, 0.0  ;;  %v1338_v37 = vstv %s1337_s20 }
 0x283   : > { %v1319_v26 = vadd.f32 %v1318_v49, %v1304_v7  ;;  %v1305_v6 = vmul.f32 %v1248_v9, %v1193_v24  ;;  %v1283_v3 = vpop.permute.xlu0 %1282  ;;  %v1177_v9 = vadd.f32 %v1176_v22, %v1031_v52  ;;  %v1200_v1 = vmax.f32 %v1174_v18, 0.0  ;;  %v1041_v2 = vpop.permute.xlu1 %1040 }
 0x284   : > { %v1185_v12 = vadd.f32 %v1456_v21, %v1041_v2 }
 0x285   : > { %v1320_v42 = vadd.f32 %v1319_v26, %v1305_v6  ;;  %v1201_v50 = vmax.f32 %v1177_v9, 0.0  ;;  %v1312_v46 = vmul.f32 %v1283_v3, %v1200_v1 }
 0x286   : > { %v1203_v0 = vmax.f32 %v1185_v12, 0.0 }
 0x287   : > { %v1321_v54 = vadd.f32 %v1320_v42, %v1306_v5  ;;  %v1288_v40 = vpop.permute.xlu0 %1287  ;;  %v1293_v13 = vpop.permute.xlu1 %1292 }
 0x288   : > { %v1313_v11 = vmul.f32 %v1288_v40, %v1201_v50  ;;  %v1314_v38 = vmul.f32 %v1293_v13, %v1202_v60 }
 0x289   : > { %v1322_v20 = vadd.f32 %v1321_v54, %v1307_v28 }
 0x28b   : > { %v1323_v43 = vadd.f32 %v1322_v20, %v1308_v55  ;;  %v1298_v36 = vpop.permute.xlu0 %1297 }
 0x28c   : > { %v1315_v35 = vmul.f32 %v1298_v36, %v1203_v0 }
 0x28d   : > { %v1324_v44 = vadd.f32 %v1323_v43, %v1309_v14 }
 0x28f   : > { %v1325_v30 = vadd.f32 %v1324_v44, %v1310_v29 }
 0x291   : > { %v1326_v31 = vadd.f32 %v1325_v30, %v1311_v62 }
 0x293   : > { %v1327_v48 = vadd.f32 %v1326_v31, %v1312_v46 }
 0x295   : > { %v1328_v58 = vadd.f32 %v1327_v48, %v1313_v11 }
 0x297   : > { %v1329_v56 = vadd.f32 %v1328_v58, %v1314_v38 }
 0x299   : > { %v1330_v10 = vadd.f32 %v1329_v56, %v1315_v35 }
 0x29b   : > { %v1331_v17 = vrot.slane %v1330_v10, 4 }
 0x29d   : > { %v1332_v32 = vadd.f32 %v1331_v17, %v1330_v10 }
 0x29f   : > { %v1333_v57 = vrot.slane %v1332_v32, 2 }
 0x2a1   : > { %v1334_v59 = vadd.f32 %v1333_v57, %v1332_v32 }
 0x2a3   : > { %v1335_v21 = vrot.slane %v1334_v59, 1 }
 0x2a5   : > { %v1336_v25 = vadd.f32 %v1335_v21, %v1334_v59 }
 0x2a7   : > { %v1339_v22 = vadd.f32 %v1338_v37, %v1336_v25 }
 0x2a9   : > { %1340 = vst [vmem:[%s272_s23] sm:$0x1] %v1339_v22 }
 0x2aa PF: > { %s18_s26 = sadd.s32 1, %s1542_s26  }
 0x2ab   : > { %p15_p4 = scmp.ge.s32.totalorder %s18_s26, 4  }
 0x2ad   :  { %17 = sbr.rel (!%p15_p4) target bundleno = 2 (0x2), region = 78 }

</bundles_post_ra>
